<compile_context>
chip_gen: v5e
topology: v5e:2x2
jax: 0.10.0
libtpu: 0.0.40
codegen_flags: <defaults>
</compile_context>

<pallas_src>
import functools

import jax
import jax.numpy as jnp
from jax.experimental import pallas as pl
from jax.experimental.pallas import tpu as pltpu

LANE = 128

# ---- packed-parameter layout (static row offsets) -----------------------------------------
# bf16 matmul-weight blob: (row_start, rows, cols); rows padded to 128 lanes, bf16 tile = (16,128)
_W2 = (0, 32, 64)
_W3 = (32, 16, 32)
_W4 = (48, 32, 16)
_W5 = (80, 64, 32)
_WM_ROWS = 144

# f32 column-vector blob (w1, biases, w6, b6): (row_start, rows)
_V_W1 = (0, 64)
_V_B1 = (64, 64)
_V_B2 = (128, 32)
_V_B3 = (160, 16)
_V_B4 = (176, 32)
_V_B5 = (208, 64)
_V_W6 = (272, 64)
_V_B6 = (336, 1)
_VEC_ROWS = 344


def _round_up(n, m):
    return ((n + m - 1) // m) * m


def autoencoder_kernel(x_ref, wm_ref, vec_ref, o_ref):
    """Full encoder+decoder MLP on one lane-tile of the batch, resident in VMEM.

    x_ref  : (1, TB) f32          -- batch on lanes
    wm_ref : (144, 128) bf16      -- packed W2..W5, PyTorch (out, in) layout, lane-padded
    vec_ref: (344, 1) f32         -- packed w1, b1..b5, w6, b6 column vectors
    """
    x = x_ref[...]                                                  # (1, TB) f32

    def vec(seg):
        s, n = seg
        return vec_ref[s:s + n, :]                                  # (n, 1) f32, static slice

    def wmat(seg):
        s, n, c = seg
        return wm_ref[s:s + n, 0:c]                                 # (n, c) bf16, static slice

    # Layer 1 (in=1): broadcast FMA on the VPU, no MXU round trip.
    h = jnp.maximum(vec(_V_W1) * x + vec(_V_B1), 0.0)               # (64, TB) f32

    def dense_relu(wseg, bseg, h):
        # bf16 MXU operands, f32 accumulation; bias add + ReLU in f32.
        y = jnp.dot(wmat(wseg), h.astype(jnp.bfloat16),
                    preferred_element_type=jnp.float32) + vec(bseg)
        return jnp.maximum(y, 0.0)

    h = dense_relu(_W2, _V_B2, h)                                   # (32, TB)
    h = dense_relu(_W3, _V_B3, h)                                   # (16, TB)
    h = dense_relu(_W4, _V_B4, h)                                   # (32, TB)
    h = dense_relu(_W5, _V_B5, h)                                   # (64, TB)

    # Layer 6 (out=1): elementwise multiply + sublane reduce (VPU/XLU), f32, no ReLU.
    y = jnp.sum(h * vec(_V_W6), axis=0, keepdims=True) + vec(_V_B6)  # (1, TB)
    o_ref[...] = y.astype(o_ref.dtype)


def _prepare_params(params):
    """params: list of (W, b) in PyTorch layout: W (out, in), b (out,). Returns packed blobs."""
    (w1, b1), (w2, b2), (w3, b3), (w4, b4), (w5, b5), (w6, b6) = params

    wm = jnp.zeros((_WM_ROWS, LANE), jnp.float32)
    for (s, n, c), w in ((_W2, w2), (_W3, w3), (_W4, w4), (_W5, w5)):
        wm = wm.at[s:s + n, 0:c].set(w)
    wm = wm.astype(jnp.bfloat16)

    vec = jnp.zeros((_VEC_ROWS, 1), jnp.float32)
    for (s, n), v in ((_V_W1, w1.reshape(-1)), (_V_B1, b1), (_V_B2, b2),
                      (_V_B3, b3), (_V_B4, b4), (_V_B5, b5),
                      (_V_W6, w6.reshape(-1)), (_V_B6, b6)):
        vec = vec.at[s:s + n, 0].set(v)
    return wm, vec


def autoencoder_forward(x, params, *, tile_b=8192):
    """x: (B, 1) float32 (a batch of scalar samples). Returns (B, 1) float32."""
    B = x.shape[0]
    xt = x.reshape(1, B)                                # batch onto the lane axis

    # Lane tile: multiple of 128, at most `tile_b`, and at most ceil(B/2) rounded up so that
    # moderate/large batches produce >= 2 grid steps (shards across v7x's two TensorCores).
    big = _round_up(tile_b, LANE)
    half = _round_up(-(-B // 2), LANE)
    tb = max(LANE, min(big, half))
    Bp = _round_up(B, tb)
    if Bp != B:
        xt = jnp.pad(xt, ((0, 0), (0, Bp - B)))
    num_tiles = Bp // tb

    wm, vec = _prepare_params(params)

    flops_per_sample = 2 * (1 * 64 + 64 * 32 + 32 * 16 + 16 * 32 + 32 * 64 + 64 * 1)
    param_bytes = int(wm.size) * wm.dtype.itemsize + int(vec.size) * vec.dtype.itemsize
    cost = pl.CostEstimate(
        flops=flops_per_sample * Bp,
        transcendentals=0,
        bytes_accessed=8 * Bp + param_bytes,
    )

    out = pl.pallas_call(
        autoencoder_kernel,
        out_shape=jax.ShapeDtypeStruct((1, Bp), jnp.float32),
        grid_spec=pltpu.PrefetchScalarGridSpec(
            num_scalar_prefetch=0,
            grid=(num_tiles,),
            in_specs=[
                pl.BlockSpec((1, tb), lambda i: (0, i)),          # x tile over batch lanes
                pl.BlockSpec((_WM_ROWS, LANE), lambda i: (0, 0)),  # resident bf16 weight blob
                pl.BlockSpec((_VEC_ROWS, 1), lambda i: (0, 0)),    # resident f32 vector blob
            ],
            out_specs=pl.BlockSpec((1, tb), lambda i: (0, i)),
        ),
        compiler_params=pltpu.CompilerParams(
            dimension_semantics=("parallel",),
            vmem_limit_bytes=32 * 1024 * 1024,   # raises v5e's 16 MiB default; safe on v6e/v7x
        ),
        cost_estimate=cost,
    )(xt, wm, vec)

    return out[:, :B].reshape(B, 1)


def init_params(key):
    """Deterministic init mimicking nn.Linear: W (out, in), b (out,)."""
    dims = [(1, 64), (64, 32), (32, 16), (16, 32), (32, 64), (64, 1)]
    params = []
    for (fan_in, fan_out) in dims:
        key, kw, kb = jax.random.split(key, 3)
        bound = 1.0 / jnp.sqrt(fan_in)
        w = jax.random.uniform(kw, (fan_out, fan_in), jnp.float32, -bound, bound)
        b = jax.random.uniform(kb, (fan_out,), jnp.float32, -bound, bound)
        params.append((w, b))
    return params


def reference_forward(x, params):
    """Pure-JAX f32 reference matching PyTorch semantics: y = x @ W.T + b."""
    h = x
    for i, (w, b) in enumerate(params):
        h = h @ w.T + b
        if i != len(params) - 1:
            h = jnp.maximum(h, 0.0)
    return h


def reference_forward_mixed(x, params):
    """Reference matching the kernel's precision: bf16 MXU operands on layers 2..5,
    f32 accumulation, f32 everywhere else."""
    (w1, b1), (w2, b2), (w3, b3), (w4, b4), (w5, b5), (w6, b6) = params
    h = jnp.maximum(x @ w1.T + b1, 0.0)
    for w, b in ((w2, b2), (w3, b3), (w4, b4), (w5, b5)):
        y = jnp.dot(h.astype(jnp.bfloat16), w.astype(jnp.bfloat16).T,
                    preferred_element_type=jnp.float32) + b
        h = jnp.maximum(y, 0.0)
    return h @ w6.T + b6


if __name__ == "__main__":
    key = jax.random.PRNGKey(0)
    key, kx1, kx2 = jax.random.split(key, 3)
    params = init_params(key)

    fwd = jax.jit(functools.partial(autoencoder_forward, params=params))

    # Case 1: small batch -> single lane tile (padded to 128).
    B1 = 64
    x1 = jax.random.normal(kx1, (B1, 1), jnp.float32)
    out1 = jax.block_until_ready(fwd(x1))
    assert out1.shape == (B1, 1)
    assert jnp.allclose(out1, reference_forward_mixed(x1, params), rtol=2e-3, atol=1e-4), \
        "mismatch vs precision-matched reference (B=64)"
    assert jnp.allclose(out1, reference_forward(x1, params), rtol=2e-2, atol=1e-2), \
        "mismatch vs f32 reference (B=64)"

    # Case 2: batch that exercises multiple grid tiles and lane padding.
    B2 = 300
    x2 = jax.random.normal(kx2, (B2, 1), jnp.float32)
    out2 = jax.block_until_ready(fwd(x2))
    assert out2.shape == (B2, 1)
    assert jnp.allclose(out2, reference_forward_mixed(x2, params), rtol=2e-3, atol=1e-4), \
        "mismatch vs precision-matched reference (B=300)"
    assert jnp.allclose(out2, reference_forward(x2, params), rtol=2e-2, atol=1e-2), \
        "mismatch vs f32 reference (B=300)"

    print("KERNEL_OK")
</pallas_src>

<mosaic_0001>
module attributes {stable_mosaic.version = 11 : i64} {
  func.func @autoencoder_kernel(%arg0: i32, %arg1: memref<1x128xf32, #tpu.memory_space<vmem>>, %arg2: memref<144x128xbf16, #tpu.memory_space<vmem>>, %arg3: memref<344x1xf32, #tpu.memory_space<vmem>>, %arg4: memref<1x128xf32, #tpu.memory_space<vmem>>) attributes {dimension_semantics = [#tpu.dimension_semantics<parallel>], iteration_bounds = array<i64: 1>, scalar_prefetch = 0 : i64, scratch_operands = 0 : i64, tpu.core_type = #tpu.core_type<tc>, window_params = [{transform_indices = @transform_0, window_bounds = array<i64: 1, 128>}, {pipeline_mode = #tpu.pipeline_mode<synchronous>, transform_indices = @transform_1, window_bounds = array<i64: 144, 128>}, {pipeline_mode = #tpu.pipeline_mode<synchronous>, transform_indices = @transform_2, window_bounds = array<i64: 344, 1>}, {transform_indices = @transform_3, window_bounds = array<i64: 1, 128>}]} {
    %c0 = arith.constant 0 : index
    %c0_0 = arith.constant 0 : index
    %0 = vector.load %arg1[%c0, %c0_0] : memref<1x128xf32, #tpu.memory_space<vmem>>, vector<1x128xf32>
    %c0_1 = arith.constant 0 : index
    %c0_2 = arith.constant 0 : index
    %1 = vector.load %arg3[%c0_1, %c0_2] : memref<344x1xf32, #tpu.memory_space<vmem>>, vector<64x1xf32>
    %2 = vector.broadcast %1 : vector<64x1xf32> to vector<64x128xf32>
    %3 = vector.broadcast %0 : vector<1x128xf32> to vector<64x128xf32>
    %4 = arith.mulf %2, %3 : vector<64x128xf32>
    %c64 = arith.constant 64 : index
    %c0_3 = arith.constant 0 : index
    %5 = vector.load %arg3[%c64, %c0_3] : memref<344x1xf32, #tpu.memory_space<vmem>>, vector<64x1xf32>
    %6 = vector.broadcast %5 : vector<64x1xf32> to vector<64x128xf32>
    %7 = arith.addf %4, %6 : vector<64x128xf32>
    %cst = arith.constant 0.000000e+00 : f32
    %8 = vector.broadcast %cst : f32 to vector<64x128xf32>
    %9 = arith.maximumf %7, %8 : vector<64x128xf32>
    %c0_4 = arith.constant 0 : index
    %c0_5 = arith.constant 0 : index
    %10 = vector.load %arg2[%c0_4, %c0_5] : memref<144x128xbf16, #tpu.memory_space<vmem>>, vector<32x64xbf16>
    %11 = arith.truncf %9 : vector<64x128xf32> to vector<64x128xbf16>
    %cst_6 = arith.constant dense<0.000000e+00> : vector<32x128xf32>
    %12 = tpu.matmul %10, %11, %cst_6 {dimension_numbers = #tpu.dot_dimension_numbers<[1], [0], [0], [1], [0, 0, 1, 1], [], []>} : vector<32x64xbf16>, vector<64x128xbf16>, vector<32x128xf32> -> vector<32x128xf32>
    %c128 = arith.constant 128 : index
    %c0_7 = arith.constant 0 : index
    %13 = vector.load %arg3[%c128, %c0_7] : memref<344x1xf32, #tpu.memory_space<vmem>>, vector<32x1xf32>
    %14 = vector.broadcast %13 : vector<32x1xf32> to vector<32x128xf32>
    %15 = arith.addf %12, %14 : vector<32x128xf32>
    %cst_8 = arith.constant 0.000000e+00 : f32
    %16 = vector.broadcast %cst_8 : f32 to vector<32x128xf32>
    %17 = arith.maximumf %15, %16 : vector<32x128xf32>
    %c32 = arith.constant 32 : index
    %c0_9 = arith.constant 0 : index
    %18 = vector.load %arg2[%c32, %c0_9] : memref<144x128xbf16, #tpu.memory_space<vmem>>, vector<16x32xbf16>
    %19 = arith.truncf %17 : vector<32x128xf32> to vector<32x128xbf16>
    %cst_10 = arith.constant dense<0.000000e+00> : vector<16x128xf32>
    %20 = tpu.matmul %18, %19, %cst_10 {dimension_numbers = #tpu.dot_dimension_numbers<[1], [0], [0], [1], [0, 0, 1, 1], [], []>} : vector<16x32xbf16>, vector<32x128xbf16>, vector<16x128xf32> -> vector<16x128xf32>
    %c160 = arith.constant 160 : index
    %c0_11 = arith.constant 0 : index
    %21 = vector.load %arg3[%c160, %c0_11] : memref<344x1xf32, #tpu.memory_space<vmem>>, vector<16x1xf32>
    %22 = vector.broadcast %21 : vector<16x1xf32> to vector<16x128xf32>
    %23 = arith.addf %20, %22 : vector<16x128xf32>
    %cst_12 = arith.constant 0.000000e+00 : f32
    %24 = vector.broadcast %cst_12 : f32 to vector<16x128xf32>
    %25 = arith.maximumf %23, %24 : vector<16x128xf32>
    %c48 = arith.constant 48 : index
    %c0_13 = arith.constant 0 : index
    %26 = vector.load %arg2[%c48, %c0_13] : memref<144x128xbf16, #tpu.memory_space<vmem>>, vector<32x16xbf16>
    %27 = arith.truncf %25 : vector<16x128xf32> to vector<16x128xbf16>
    %cst_14 = arith.constant dense<0.000000e+00> : vector<32x128xf32>
    %28 = tpu.matmul %26, %27, %cst_14 {dimension_numbers = #tpu.dot_dimension_numbers<[1], [0], [0], [1], [0, 0, 1, 1], [], []>} : vector<32x16xbf16>, vector<16x128xbf16>, vector<32x128xf32> -> vector<32x128xf32>
    %c176 = arith.constant 176 : index
    %c0_15 = arith.constant 0 : index
    %29 = vector.load %arg3[%c176, %c0_15] : memref<344x1xf32, #tpu.memory_space<vmem>>, vector<32x1xf32>
    %30 = vector.broadcast %29 : vector<32x1xf32> to vector<32x128xf32>
    %31 = arith.addf %28, %30 : vector<32x128xf32>
    %cst_16 = arith.constant 0.000000e+00 : f32
    %32 = vector.broadcast %cst_16 : f32 to vector<32x128xf32>
    %33 = arith.maximumf %31, %32 : vector<32x128xf32>
    %c80 = arith.constant 80 : index
    %c0_17 = arith.constant 0 : index
    %34 = vector.load %arg2[%c80, %c0_17] : memref<144x128xbf16, #tpu.memory_space<vmem>>, vector<64x32xbf16>
    %35 = arith.truncf %33 : vector<32x128xf32> to vector<32x128xbf16>
    %cst_18 = arith.constant dense<0.000000e+00> : vector<64x128xf32>
    %36 = tpu.matmul %34, %35, %cst_18 {dimension_numbers = #tpu.dot_dimension_numbers<[1], [0], [0], [1], [0, 0, 1, 1], [], []>} : vector<64x32xbf16>, vector<32x128xbf16>, vector<64x128xf32> -> vector<64x128xf32>
    %c208 = arith.constant 208 : index
    %c0_19 = arith.constant 0 : index
    %37 = vector.load %arg3[%c208, %c0_19] : memref<344x1xf32, #tpu.memory_space<vmem>>, vector<64x1xf32>
    %38 = vector.broadcast %37 : vector<64x1xf32> to vector<64x128xf32>
    %39 = arith.addf %36, %38 : vector<64x128xf32>
    %cst_20 = arith.constant 0.000000e+00 : f32
    %40 = vector.broadcast %cst_20 : f32 to vector<64x128xf32>
    %41 = arith.maximumf %39, %40 : vector<64x128xf32>
    %c272 = arith.constant 272 : index
    %c0_21 = arith.constant 0 : index
    %42 = vector.load %arg3[%c272, %c0_21] : memref<344x1xf32, #tpu.memory_space<vmem>>, vector<64x1xf32>
    %43 = vector.broadcast %42 : vector<64x1xf32> to vector<64x128xf32>
    %44 = arith.mulf %41, %43 : vector<64x128xf32>
    %cst_22 = arith.constant dense<0.000000e+00> : vector<128xf32>
    %45 = vector.multi_reduction <add>, %44, %cst_22 [0] : vector<64x128xf32> to vector<128xf32>
    %46 = vector.shape_cast %45 : vector<128xf32> to vector<1x128xf32>
    %c336 = arith.constant 336 : index
    %c0_23 = arith.constant 0 : index
    %47 = vector.load %arg3[%c336, %c0_23] : memref<344x1xf32, #tpu.memory_space<vmem>>, vector<1x1xf32>
    %48 = vector.broadcast %47 : vector<1x1xf32> to vector<1x128xf32>
    %49 = arith.addf %46, %48 : vector<1x128xf32>
    %c0_24 = arith.constant 0 : index
    %c0_25 = arith.constant 0 : index
    %50 = vector.load %arg4[%c0_24, %c0_25] : memref<1x128xf32, #tpu.memory_space<vmem>>, vector<1x128xf32>
    tpu.vector_store %arg4[%c0_24, %c0_25], %49 {strides = array<i32>} : memref<1x128xf32, #tpu.memory_space<vmem>>, vector<1x128xf32>,
    return
  }
  func.func @transform_0(%arg0: i32) -> (i32, i32) {
    %c0_i32 = arith.constant 0 : i32
    %c0_i32_0 = arith.constant 0 : i32
    return %c0_i32, %arg0 : i32, i32
  }
  func.func @transform_1(%arg0: i32) -> (i32, i32) {
    %c0_i32 = arith.constant 0 : i32
    %c0_i32_0 = arith.constant 0 : i32
    %c0_i32_1 = arith.constant 0 : i32
    return %c0_i32, %c0_i32_0 : i32, i32
  }
  func.func @transform_2(%arg0: i32) -> (i32, i32) {
    %c0_i32 = arith.constant 0 : i32
    %c0_i32_0 = arith.constant 0 : i32
    %c0_i32_1 = arith.constant 0 : i32
    return %c0_i32, %c0_i32_0 : i32, i32
  }
  func.func @transform_3(%arg0: i32) -> (i32, i32) {
    %c0_i32 = arith.constant 0 : i32
    %c0_i32_0 = arith.constant 0 : i32
    return %c0_i32, %arg0 : i32, i32
  }
}

</mosaic_0001>

<bundles_post_ra>
// kernel: autoencoder_forward.1
= control target key start
LH: loop header
LB: loop body
LE: loop exit
PB: predicated region body
PF: predicated region fallthrough
CT: control target
= control target key end

     0   :  { %8 = vsyncpa [#allocation3], 0  ;;  %s726_s0 = inlined_call_operand.vmem [shape: f32[1,128], index: 0, kind: input, shape index: {}]   ;;  %s727_s1 = inlined_call_operand.hbm [shape: bf16[144,128], index: 1, kind: input, shape index: {}]   ;;  %s728_s2 = inlined_call_operand.hbm [shape: f32[344,1], index: 2, kind: input, shape index: {}]   ;;  %s729_s3 = inlined_call_operand.vmem [shape: f32[1,128], index: 3, kind: output, shape index: {}]  }
   0x1   :  { %s16_s14 = sshll.u32 %s727_s1, 4  ;;  %s17_s14 = int_to_ptr.hbm [resolvable:$true] %s16_s14 }
   0x2   :  { %9 = vsyncpa [#allocation5], 0  ;;  %s682_s15 = smov [#allocation2]   ;;  %s29_s19 = sshll.u32 %s728_s2, 4  ;;  %s30_s19 = int_to_ptr.hbm [resolvable:$true] %s29_s19 }
   0x3   :  { %s18_s16 = sshll.u32 %s682_s15, 4  ;;  %s683_s20 = smov 64   ;;  %s19_s16 = int_to_ptr.vmem [resolvable:$true] %s18_s16 }
   0x4   :  { %s684_s21 = smov 4   ;;  %s685_s22 = smov [#allocation4]  }
   0x5   :  { %24 = dma.hbm_to_vmem [thread:$0]  %s17_s14, 1152, %s19_s16, [#allocation3], %s683_s20, %s683_s20, %s684_s21  }
   0x6   :  { %s31_s23 = sshll.u32 %s685_s22, 4  ;;  %s686_s24 = smov 128   ;;  %s32_s23 = int_to_ptr.vmem [resolvable:$true] %s31_s23 }
   0x7   :  { %s687_s25 = smov 8  }
   0x8   :  { %37 = dma.hbm_to_vmem [thread:$0]  %s30_s19, 5504, %s32_s23, [#allocation5], %s686_s24, %s686_s24, %s687_s25  }
   0x9   :  { %678 = dma.done.wait [#allocation3], 1152  }
   0xa   :  { %679 = vsyncadd [#allocation3], 4294966144 }
   0xb   :  { %680 = dma.done.wait [#allocation5], 5504  }
   0xc   :  { %681 = vsyncadd [#allocation5], 4294961792  ;;  %v688_v0 = vmov 0   ;;  %v113_v1 = vld [vmem:[#allocation4 + $0x70] sm:$0xff]  ;;  %v52_v3 = vld [vmem:[#allocation4 + $0x20] sm:$0xff]  ;;  %vm213_vm0 = vcmask 523264  }
   0xd   :  { %628 = vset.pattern.permute.xlu2 %v688_v0  ;;  %627 = vset.pattern.permute.xlu1 %v688_v0  ;;  %v54_v2 = vld [vmem:[#allocation4 + $0x30] sm:$0xff]  ;;  %v114_v4 = vld [vmem:[#allocation4 + $0x78] sm:$0xff]  ;;  %v53_v6 = vld [vmem:[#allocation4 + $0x28] sm:$0xff]  ;;  %vm264_vm1 = vcmask 261120   ;;  %vm323_vm2 = vcmask 130048  }
   0xe   :  { %626 = vset.pattern.permute.xlu0 %v688_v0  ;;  %147 = vperm.xlu1 %627, %v113_v1   ;;  %v55_v5 = vld [vmem:[#allocation4 + $0x38] sm:$0xff]  ;;  %v112_v7 = vld [vmem:[#allocation4 + $0x68] sm:$0xff]  ;;  %v111_v8 = vld [vmem:[#allocation4 + $0x60] sm:$0xff] }
   0xf   :  { %88 = vperm.xlu0 %626, %v54_v2   ;;  %78 = vperm.xlu2 %628, %v52_v3   ;;  %v50_v9 = vld [vmem:[#allocation4 + $0x10] sm:$0xff]  ;;  %v51_v11 = vld [vmem:[#allocation4 + $0x18] sm:$0xff]  ;;  %v49_v13 = vld [vmem:[#allocation4 + $0x8] sm:$0xff] }
  0x10   :  { %v109_v10 = vld [vmem:[#allocation4 + $0x50] sm:$0xff]  ;;  %v110_v12 = vld [vmem:[#allocation4 + $0x58] sm:$0xff]  ;;  %v48_v14 = vld [vmem:[#allocation4] sm:$0xff] }
  0x11   :  { %v107_v15 = vld [vmem:[#allocation4 + $0x40] sm:$0xff]  ;;  %v181_v16 = vld [vmem:[#allocation4 + $0x90] sm:$0xff]  ;;  %v108_v17 = vld [vmem:[#allocation4 + $0x48] sm:$0xff] }
  0x12   :  { %v182_v18 = vld [vmem:[#allocation4 + $0x98] sm:$0xff]  ;;  %v180_v19 = vld [vmem:[#allocation4 + $0x88] sm:$0xff]  ;;  %v179_v20 = vld [vmem:[#allocation4 + $0x80] sm:$0xff] }
  0x13   :  { %v247_v21 = vld [vmem:[#allocation4 + $0xa0] sm:$0xff]  ;;  %v248_v23 = vld [vmem:[#allocation4 + $0xa8] sm:$0xff]  ;;  %v290_v25 = vld [vmem:[#allocation4 + $0xb8] sm:$0xff] }
  0x14   :  { %v291_v22 = vld [vmem:[#allocation4 + $0xc0] sm:$0xff]  ;;  %v292_v24 = vld [vmem:[#allocation4 + $0xc8] sm:$0xff]  ;;  %v289_v26 = vld [vmem:[#allocation4 + $0xb0] sm:$0xff] }
  0x15   :  { %v363_v27 = vld [vmem:[#allocation4 + $0xd0] sm:$0xff]  ;;  %v365_v28 = vld [vmem:[#allocation4 + $0xe0] sm:$0xff]  ;;  %v364_v29 = vld [vmem:[#allocation4 + $0xd8] sm:$0xff] }
  0x16   :  { %152 = vperm.xlu1 %627, %v114_v4   ;;  %v366_v30 = vld [vmem:[#allocation4 + $0xe8] sm:$0xff]  ;;  %v368_v31 = vld [vmem:[#allocation4 + $0xf8] sm:$0xff]  ;;  %v367_v32 = vld [vmem:[#allocation4 + $0xf0] sm:$0xff] }
  0x17   :  { %93 = vperm.xlu0 %626, %v55_v5   ;;  %83 = vperm.xlu2 %628, %v53_v6   ;;  %v480_v33 = vld [vmem:[#allocation4 + $0x110] sm:$0xff]  ;;  %v482_v34 = vld [vmem:[#allocation4 + $0x120] sm:$0xff]  ;;  %v481_v35 = vld [vmem:[#allocation4 + $0x118] sm:$0xff] }
  0x18   :  { %v483_v36 = vld [vmem:[#allocation4 + $0x128] sm:$0xff]  ;;  %v484_v37 = vld [vmem:[#allocation4 + $0x130] sm:$0xff]  ;;  %v369_v38 = vld [vmem:[#allocation4 + $0x100] sm:$0xff] }
  0x19   :  { %v370_v39 = vld [vmem:[#allocation4 + $0x108] sm:$0xff]  ;;  %v486_v40 = vld [vmem:[#allocation4 + $0x140] sm:$0xff]  ;;  %v485_v41 = vld [vmem:[#allocation4 + $0x138] sm:$0xff] }
  0x1a   :  { %v487_v42 = vld [vmem:[#allocation4 + $0x148] sm:$0xff]  ;;  %v549_v44 = vld [vmem:[#allocation4 + $0x150] sm:$0x1]  ;;  %v629_v47 = vld [vmem:[%s726_s0] ss:$0 sm:$0xff] }
  0x1e   :  { %142 = vperm.xlu1 %627, %v112_v7  }
  0x1f   :  { %137 = vperm.xlu0 %626, %v111_v8   ;;  %68 = vperm.xlu2 %628, %v50_v9  }
  0x26   :  { %127 = vperm.xlu1 %627, %v109_v10  }
  0x27   :  { %73 = vperm.xlu0 %626, %v51_v11   ;;  %132 = vperm.xlu2 %628, %v110_v12  }
  0x2e   :  { %63 = vperm.xlu1 %627, %v49_v13  }
  0x2f   :  { %58 = vperm.xlu0 %626, %v48_v14   ;;  %117 = vperm.xlu2 %628, %v107_v15  }
  0x36   :  { %195 = vperm.xlu1 %627, %v181_v16  }
  0x37   :  { %122 = vperm.xlu0 %626, %v108_v17   ;;  %200 = vperm.xlu2 %628, %v182_v18  }
  0x3e   :  { %190 = vperm.xlu1 %627, %v180_v19  }
  0x3f   :  { %185 = vperm.xlu0 %626, %v179_v20   ;;  %251 = vperm.xlu2 %628, %v247_v21  }
  0x46   :  { %305 = vperm.xlu1 %627, %v291_v22  }
  0x47   :  { %256 = vperm.xlu0 %626, %v248_v23   ;;  %310 = vperm.xlu2 %628, %v292_v24  }
  0x4e   :  { %300 = vperm.xlu1 %627, %v290_v25   ;;  %v608_v25 = vld [vmem:[#allocation2] sm:$0xff] }
  0x4f   :  { %295 = vperm.xlu0 %626, %v289_v26   ;;  %373 = vperm.xlu2 %628, %v363_v27   ;;  %v609_v26 = vld [vmem:[#allocation2 + $0x8] sm:$0xff] }
  0x56   :  { %383 = vperm.xlu1 %627, %v365_v28  }
  0x57   :  { %378 = vperm.xlu0 %626, %v364_v29   ;;  %388 = vperm.xlu2 %628, %v366_v30  }
  0x5e   :  { %398 = vperm.xlu1 %627, %v368_v31  }
  0x5f   :  { %393 = vperm.xlu0 %626, %v367_v32   ;;  %490 = vperm.xlu2 %628, %v480_v33  }
  0x66   :  { %500 = vperm.xlu1 %627, %v482_v34  }
  0x67   :  { %495 = vperm.xlu0 %626, %v481_v35   ;;  %505 = vperm.xlu2 %628, %v483_v36  }
  0x69   :  { %v79_v43 = vpop.permute.xlu2 %78 }
  0x6a   :  { %v103_v57 = vmul.f32 %v629_v47, %v79_v43 }
  0x6e   :  { %510 = vperm.xlu1 %627, %v484_v37  }
  0x6f   :  { %403 = vperm.xlu0 %626, %v369_v38   ;;  %408 = vperm.xlu2 %628, %v370_v39  }
  0x71   :  { %v84_v48 = vpop.permute.xlu2 %83 }
  0x72   :  { %v104_v58 = vmul.f32 %v629_v47, %v84_v48 }
  0x76   :  { %520 = vperm.xlu1 %627, %v486_v40  }
  0x77   :  { %515 = vperm.xlu0 %626, %v485_v41   ;;  %525 = vperm.xlu2 %628, %v487_v42  }
  0x79   :  { %v69_v59 = vpop.permute.xlu2 %68 }
  0x7a   :  { %v101_v4 = vmul.f32 %v629_v47, %v69_v59 }
  0x7f   :  { %552 = vperm.xlu0 %626, %v549_v44  }
  0x80   :  { %v148_v45 = vpop.permute.xlu1 %147 }
  0x81   :  { %v89_v46 = vpop.permute.xlu0 %88  ;;  %v133_v9 = vpop.permute.xlu2 %132 }
  0x82   :  { %v105_v49 = vmul.f32 %v629_v47, %v89_v46 }
  0x84   :  { %v161_v53 = vadd.f32 %v148_v45, %v105_v49  ;;  %v610_v45 = vld [vmem:[#allocation2 + $0x10] sm:$0xff] }
  0x86   :  { %v169_v55 = vmax.f32 %v161_v53, 0.0 }
  0x88   :  { %v153_v50 = vpop.permute.xlu1 %152 }
  0x89   :  { %v94_v51 = vpop.permute.xlu0 %93  ;;  %v118_v17 = vpop.permute.xlu2 %117 }
  0x8a   :  { %v106_v52 = vmul.f32 %v629_v47, %v94_v51 }
  0x8c   :  { %v162_v54 = vadd.f32 %v153_v50, %v106_v52 }
  0x8e   :  { %v170_v56 = vmax.f32 %v162_v54, 0.0 }
  0x90   :  { %v178_v60 = vpack.c.bf16 %v170_v56, %v169_v55  ;;  %v143_v61 = vpop.permute.xlu1 %142  ;;  %v611_v55 = vld [vmem:[#allocation2 + $0x18] sm:$0xff]  ;;  %v612_v56 = vld [vmem:[#allocation2 + $0x20] sm:$0xff] }
  0x91   :  { %v138_v62 = vpop.permute.xlu0 %137  ;;  %v160_v63 = vadd.f32 %v143_v61, %v104_v58  ;;  %v201_v31 = vpop.permute.xlu2 %200 }
  0x92   :  { %v159_v0 = vadd.f32 %v138_v62, %v103_v57  ;;  %224 = vmatpush.bf16.msra.mxu0 %v178_v60 }
  0x93   :  { %v168_v1 = vmax.f32 %v160_v63, 0.0 }
  0x94   :  { %v167_v2 = vmax.f32 %v159_v0, 0.0 }
  0x96   :  { %v177_v3 = vpack.c.bf16 %v168_v1, %v167_v2 }
  0x98   :  { %225 = vmatpush.bf16.msra.mxu0 %v177_v3  ;;  %v128_v5 = vpop.permute.xlu1 %127 }
  0x99   :  { %v74_v6 = vpop.permute.xlu0 %73  ;;  %v157_v7 = vadd.f32 %v128_v5, %v101_v4 }
  0x9a   :  { %v102_v8 = vmul.f32 %v629_v47, %v74_v6 }
  0x9b   :  { %v165_v11 = vmax.f32 %v157_v7, 0.0 }
  0x9c   :  { %v158_v10 = vadd.f32 %v133_v9, %v102_v8 }
  0x9e   :  { %v166_v12 = vmax.f32 %v158_v10, 0.0 }
  0xa0   :  { %v176_v13 = vpack.c.bf16 %v166_v12, %v165_v11  ;;  %v64_v16 = vpop.permute.xlu1 %63  ;;  %v613_v11 = vld [vmem:[#allocation2 + $0x28] sm:$0xff]  ;;  %v614_v12 = vld [vmem:[#allocation2 + $0x30] sm:$0xff] }
  0xa1   :  { %v59_v14 = vpop.permute.xlu0 %58  ;;  %v100_v18 = vmul.f32 %v629_v47, %v64_v16 }
  0xa2   :  { %226 = vmatpush.bf16.msra.mxu0 %v176_v13  ;;  %v99_v15 = vmul.f32 %v629_v47, %v59_v14  ;;  %v252_v47 = vpop.permute.xlu2 %251  ;;  %v615_v13 = vld [vmem:[#allocation2 + $0x38] sm:$0xff]  ;;  %v616_v14 = vld [vmem:[#allocation2 + $0x40] sm:$0xff] }
  0xa4   :  { %v155_v19 = vadd.f32 %v118_v17, %v99_v15 }
  0xa6   :  { %v163_v22 = vmax.f32 %v155_v19, 0.0 }
  0xa8   :  { %v196_v29 = vpop.permute.xlu1 %195 }
  0xa9   :  { %v123_v20 = vpop.permute.xlu0 %122 }
  0xaa   :  { %v156_v21 = vadd.f32 %v123_v20, %v100_v18  ;;  %v311_v61 = vpop.permute.xlu2 %310 }
  0xac   :  { %v164_v23 = vmax.f32 %v156_v21, 0.0 }
  0xae   :  { %v175_v24 = vpack.c.bf16 %v164_v23, %v163_v22 }
  0xb0   :  { %227 = vmatpush.bf16.msra.mxu0 %v175_v24  ;;  %v191_v33 = vpop.permute.xlu1 %190 }
  0xb1   :  { %v186_v37 = vpop.permute.xlu0 %185 }
  0xb2   :  { %v374_v15 = vpop.permute.xlu2 %373 }
  0xb3   :  { %571 = vmatmul.msk.bf16.vlgmr.msra.gmra.mxu0 %vm213_vm0, %v608_v25 }
  0xb8   :  { %v306_v59 = vpop.permute.xlu1 %305 }
  0xb9   :  { %v257_v49 = vpop.permute.xlu0 %256 }
  0xba   :  { %v389_v19 = vpop.permute.xlu2 %388 }
  0xc0   :  { %v301_v63 = vpop.permute.xlu1 %300 }
  0xc1   :  { %v296_v3 = vpop.permute.xlu0 %295 }
  0xc2   :  { %v491_v24 = vpop.permute.xlu2 %490 }
  0xc3   :  { %572 = vmatmul.msk.bf16.gmra.mxu0 %vm213_vm0, %v609_v26 }
  0xc8   :  { %v384_v17 = vpop.permute.xlu1 %383 }
  0xc9   :  { %v379_v16 = vpop.permute.xlu0 %378 }
  0xd0   :  { %v399_v23 = vpop.permute.xlu1 %398 }
  0xd1   :  { %v394_v20 = vpop.permute.xlu0 %393 }
  0xd9   :  { %v496_v26 = vpop.permute.xlu0 %495 }
 0x130   :  { %v229_v27 = vpop.f32.mrf.mxu0 }
 0x131   :  { %v230_v38 = vadd.f32 %v229_v27, %v186_v37  ;;  %v404_v37 = vpop.permute.xlu0 %403 }
 0x133   :  { %v239_v43 = vmax.f32 %v230_v38, 0.0 }
 0x138   :  { %v231_v28 = vpop.f32.mrf.mxu0 }
 0x139   :  { %v232_v35 = vadd.f32 %v231_v28, %v191_v33  ;;  %v501_v28 = vpop.permute.xlu1 %500 }
 0x13b   :  { %v240_v41 = vmax.f32 %v232_v35, 0.0 }
 0x13d   :  { %v245_v44 = vpack.c.bf16 %v240_v41, %v239_v43 }
 0x140   :  { %v234_v30 = vpop.f32.mrf.mxu0 }
 0x141   :  { %v235_v32 = vadd.f32 %v234_v30, %v196_v29 }
 0x143   :  { %v241_v39 = vmax.f32 %v235_v32, 0.0 }
 0x148   :  { %v236_v34 = vpop.f32.mrf.mxu0 }
 0x149   :  { %v237_v36 = vadd.f32 %v236_v34, %v201_v31  ;;  %v506_v31 = vpop.permute.xlu2 %505 }
 0x14b   :  { %v242_v40 = vmax.f32 %v237_v36, 0.0 }
 0x14d   :  { %v246_v42 = vpack.c.bf16 %v242_v40, %v241_v39  ;;  %v511_v40 = vpop.permute.xlu1 %510 }
 0x14f   :  { %274 = vmatpush.bf16.msra.mxu1 %v246_v42 }
 0x153   :  { %275 = vmatpush.bf16.msra.mxu1 %v245_v44 }
 0x156   :  { %577 = vmatmul.msk.bf16.vlgmr.msra.gmra.mxu1 %vm264_vm1, %v610_v45 }
 0x1d3   :  { %v277_v46 = vpop.f32.mrf.mxu1 }
 0x1d4   :  { %v278_v48 = vadd.f32 %v277_v46, %v252_v47 }
 0x1d6   :  { %v282_v52 = vmax.f32 %v278_v48, 0.0 }
 0x1db   :  { %v279_v50 = vpop.f32.mrf.mxu1 }
 0x1dc   :  { %v280_v51 = vadd.f32 %v279_v50, %v257_v49  ;;  %v409_v49 = vpop.permute.xlu2 %408 }
 0x1de   :  { %v283_v53 = vmax.f32 %v280_v51, 0.0 }
 0x1e0   :  { %v288_v54 = vpack.c.bf16 %v283_v53, %v282_v52 }
 0x1e2   :  { %337 = vmatpush.bf16.msra.mxu2 %v288_v54 }
 0x1e5   :  { %586 = vmatmul.msk.bf16.vlgmr.msra.gmra.mxu2 %vm323_vm2, %v611_v55 }
 0x1f5   :  { %587 = vmatmul.msk.bf16.gmra.mxu2 %vm323_vm2, %v612_v56  ;;  %v516_v56 = vpop.permute.xlu0 %515 }
 0x268   :  { %v339_v57 = vpop.f32.mrf.mxu2 }
 0x269   :  { %v340_v4 = vadd.f32 %v339_v57, %v296_v3 }
 0x26b   :  { %v349_v9 = vmax.f32 %v340_v4, 0.0 }
 0x270   :  { %v341_v58 = vpop.f32.mrf.mxu2 }
 0x271   :  { %v342_v1 = vadd.f32 %v341_v58, %v301_v63 }
 0x273   :  { %v350_v7 = vmax.f32 %v342_v1, 0.0 }
 0x275   :  { %v361_v10 = vpack.c.bf16 %v350_v7, %v349_v9 }
 0x278   :  { %v344_v60 = vpop.f32.mrf.mxu2 }
 0x279   :  { %v345_v62 = vadd.f32 %v344_v60, %v306_v59  ;;  %v521_v59 = vpop.permute.xlu1 %520 }
 0x27b   :  { %v351_v5 = vmax.f32 %v345_v62, 0.0 }
 0x280   :  { %v346_v0 = vpop.f32.mrf.mxu2 }
 0x281   :  { %v347_v2 = vadd.f32 %v346_v0, %v311_v61 }
 0x283   :  { %v352_v6 = vmax.f32 %v347_v2, 0.0  ;;  %v526_v2 = vpop.permute.xlu2 %525 }
 0x285   :  { %v362_v8 = vpack.c.bf16 %v352_v6, %v351_v5 }
 0x287   :  { %449 = vmatpush.bf16.msrb.mxu1 %v362_v8  ;;  %617 = vmatpush.bf16.msra.mxu3 %v362_v8 }
 0x28b   :  { %450 = vmatpush.bf16.msrb.mxu1 %v361_v10  ;;  %618 = vmatpush.bf16.msra.mxu3 %v361_v10 }
 0x28e   :  { %604 = vmatmul.msk.bf16.vlgmr.msrb.gmra.mxu1 %vm264_vm1, %v613_v11  ;;  %605 = vmatmul.msk.bf16.vlgmr.msra.gmra.mxu3 %vm264_vm1, %v614_v12  ;;  %v553_v12 = vpop.permute.xlu0 %552 }
 0x29e   :  { %606 = vmatmul.msk.bf16.gmra.mxu3 %vm264_vm1, %v615_v13 }
 0x2ae   :  { %607 = vmatmul.msk.bf16.gmra.mxu3 %vm264_vm1, %v616_v14 }
 0x30b   :  { %v452_v21 = vpop.f32.mrf.mxu1 }
 0x30c   :  { %v453_v30 = vadd.f32 %v452_v21, %v374_v15 }
 0x30e   :  { %v472_v34 = vmax.f32 %v453_v30, 0.0 }
 0x310   :  { %v528_v41 = vmul.f32 %v491_v24, %v472_v34 }
 0x311   :  { %v457_v18 = vpop.f32.mrf.mxu3 }
 0x312   :  { %v458_v35 = vadd.f32 %v457_v18, %v384_v17 }
 0x313   :  { %v454_v27 = vpop.f32.mrf.mxu1 }
 0x314   :  { %v455_v29 = vadd.f32 %v454_v27, %v379_v16  ;;  %v474_v42 = vmax.f32 %v458_v35, 0.0 }
 0x316   :  { %v473_v33 = vmax.f32 %v455_v29, 0.0  ;;  %v530_v50 = vmul.f32 %v501_v28, %v474_v42 }
 0x318   :  { %v529_v38 = vmul.f32 %v496_v26, %v473_v33 }
 0x319   :  { %v459_v22 = vpop.f32.mrf.mxu3 }
 0x31a   :  { %v460_v36 = vadd.f32 %v459_v22, %v389_v19  ;;  %v536_v46 = vadd.f32 %v529_v38, %v528_v41 }
 0x31c   :  { %v475_v43 = vmax.f32 %v460_v36, 0.0  ;;  %v537_v53 = vadd.f32 %v536_v46, %v530_v50 }
 0x31e   :  { %v531_v51 = vmul.f32 %v506_v31, %v475_v43 }
 0x320   :  { %v538_v57 = vadd.f32 %v537_v53, %v531_v51 }
 0x321   :  { %v462_v25 = vpop.f32.mrf.mxu3 }
 0x322   :  { %v463_v39 = vadd.f32 %v462_v25, %v394_v20 }
 0x324   :  { %v476_v47 = vmax.f32 %v463_v39, 0.0 }
 0x326   :  { %v532_v54 = vmul.f32 %v511_v40, %v476_v47 }
 0x328   :  { %v539_v61 = vadd.f32 %v538_v57, %v532_v54 }
 0x329   :  { %v464_v32 = vpop.f32.mrf.mxu3 }
 0x32a   :  { %v465_v44 = vadd.f32 %v464_v32, %v399_v23 }
 0x32c   :  { %v477_v52 = vmax.f32 %v465_v44, 0.0 }
 0x32e   :  { %v533_v58 = vmul.f32 %v516_v56, %v477_v52 }
 0x330   :  { %v540_v0 = vadd.f32 %v539_v61, %v533_v58 }
 0x331   :  { %v467_v45 = vpop.f32.mrf.mxu3 }
 0x332   :  { %v468_v48 = vadd.f32 %v467_v45, %v404_v37 }
 0x334   :  { %v478_v55 = vmax.f32 %v468_v48, 0.0 }
 0x336   :  { %v534_v62 = vmul.f32 %v521_v59, %v478_v55 }
 0x338   :  { %v541_v3 = vadd.f32 %v540_v0, %v534_v62 }
 0x339   :  { %v469_v60 = vpop.f32.mrf.mxu3 }
 0x33a   :  { %v470_v63 = vadd.f32 %v469_v60, %v409_v49 }
 0x33c   :  { %v479_v1 = vmax.f32 %v470_v63, 0.0 }
 0x33e   :  { %v535_v4 = vmul.f32 %v526_v2, %v479_v1 }
 0x340   :  { %v542_v5 = vadd.f32 %v541_v3, %v535_v4 }
 0x342   :  { %v543_v6 = vrot.slane %v542_v5, 4 }
 0x344   :  { %v544_v7 = vadd.f32 %v543_v6, %v542_v5 }
 0x346   :  { %v545_v8 = vrot.slane %v544_v7, 2 }
 0x348   :  { %v546_v9 = vadd.f32 %v545_v8, %v544_v7 }
 0x34a   :  { %v547_v10 = vrot.slane %v546_v9, 1 }
 0x34c   :  { %v548_v11 = vadd.f32 %v547_v10, %v546_v9 }
 0x34e   :  { %v555_v13 = vadd.f32 %v553_v12, %v548_v11 }
 0x350   :  { %556 = vst [vmem:[%s729_s3] sm:$0x1] %v555_v13 }
 0x351   :  { %561 = vsyncpa [#allocation3], 1 }
 0x352   :  { %562 = vsyncpa [#allocation5], 1 }

</bundles_post_ra>
